<compile_context>
chip_gen: v5e
topology: v5e:2x2
jax: 0.10.0
libtpu: 0.0.40
codegen_flags: <defaults>
</compile_context>

<pallas_src>
import jax
import jax.numpy as jnp
from jax.experimental import pallas as pl
from jax.experimental.pallas import tpu as pltpu


# ----------------------------------------------------------------------------
# Kernels
# ----------------------------------------------------------------------------
def _make_kernel(compute_dtype, accumulate_into_out):
    """Build a matmul kernel body.

    Operands arrive in their storage dtype; if that differs from
    compute_dtype they are cast in VMEM/vregs right before the MXU op (VPU
    cast, no extra HBM traffic).
    """

    def _operands(x_ref, w_ref):
        a = x_ref[...]
        b = w_ref[...]
        if a.dtype != compute_dtype:
            a = a.astype(compute_dtype)
        if b.dtype != compute_dtype:
            b = b.astype(compute_dtype)
        return a, b

    if accumulate_into_out:
        # f32 output: accumulate directly into the grid-resident output tile
        # (output block index is constant along K), no scratch needed.
        def kernel(x_ref, w_ref, o_ref):
            @pl.when(pl.program_id(2) == 0)
            def _init():
                o_ref[...] = jnp.zeros_like(o_ref)

            a, b = _operands(x_ref, w_ref)
            o_ref[...] += jnp.dot(a, b, preferred_element_type=jnp.float32)

        return kernel

    # Low-precision output: keep an f32 scratch accumulator across K.
    def kernel(x_ref, w_ref, o_ref, acc_ref):
        @pl.when(pl.program_id(2) == 0)
        def _init():
            acc_ref[...] = jnp.zeros_like(acc_ref)

        a, b = _operands(x_ref, w_ref)
        acc_ref[...] += jnp.dot(a, b, preferred_element_type=jnp.float32)

        @pl.when(pl.program_id(2) == pl.num_programs(2) - 1)
        def _finalize():
            o_ref[...] = acc_ref[...].astype(o_ref.dtype)

    return kernel


# ----------------------------------------------------------------------------
# Tiling helpers
# ----------------------------------------------------------------------------
def _round_up(x, m):
    return ((x + m - 1) // m) * m


def _largest_divisor_tile(dim, target, align):
    """Largest tile <= target that divides `dim` and is a multiple of `align`.

    Callers always pass a `dim` that is a multiple of `align` (we pad on the
    host), so the search always succeeds with at least `align`.
    """
    if dim <= target:
        return dim
    t = (target // align) * align
    while t >= align:
        if dim % t == 0:
            return t
        t -= align
    return dim  # unreachable once dims are padded to multiples of `align`


def _pick_tile(dim, target, align, pref_align=None):
    """Divisor tile with an optional preferred (coarser) alignment, e.g. 256
    to match the 256x256 MXU on v6e/v7x when the dimension allows it."""
    if (
        pref_align is not None
        and pref_align > align
        and dim % pref_align == 0
        and target >= pref_align
    ):
        return _largest_divisor_tile(dim, target, pref_align)
    return _largest_divisor_tile(dim, target, align)


def _tile_vmem_bytes(tm, tn, tk, x_item, w_item, out_item, use_scratch):
    # Double-buffered input tiles + double-buffered output tile (+ scratch).
    est = 2 * (tm * tk * x_item + tk * tn * w_item) + 2 * tm * tn * out_item
    if use_scratch:
        est += tm * tn * 4
    return est


# ----------------------------------------------------------------------------
# Forward
# ----------------------------------------------------------------------------
def tensor_parallel_forward(
    x,
    w_shards,
    *,
    block_m=512,
    block_n=1024,
    block_k=2048,
    compute_dtype=None,   # None -> use the operand dtype (no precision change)
    weight_buffers=2,     # >2 -> pl.Buffered(n) on the weight stream (only if
                          # profiling shows exposed DMA; VMEM easily covers it)
):
    """Simulates TensorParallelNeuronModel.forward(x) -> results[0].

    x:        [B, H]        full input (same tensors fed to every shard)
    w_shards: [TP, H/TP, O] per-shard row-parallel weight slices
    returns:  [B, O]        the all-reduced output (identical on every shard)
    """
    tp, h_shard, out_dim = w_shards.shape
    b, h = x.shape
    assert h == tp * h_shard, "input hidden dim must equal TP * shard hidden dim"

    # Row-parallel TP: the full weight is the shard slices concatenated along
    # K, which is exactly a contiguous reshape — no transpose, no copy.
    w_full = w_shards.reshape(h, out_dim)

    out_dtype = x.dtype
    if compute_dtype is None:
        compute_dtype = jnp.result_type(x.dtype, w_full.dtype)
    compute_dtype = jnp.dtype(compute_dtype)

    x_item = jnp.dtype(x.dtype).itemsize
    w_item = jnp.dtype(w_full.dtype).itemsize
    out_item = jnp.dtype(out_dtype).itemsize

    # ---- pad to lane/sublane friendly sizes (guards the full-dim fallback and
    # keeps the output lane-dense; K-padding with zeros is numerically inert).
    m_align = 16 if compute_dtype.itemsize == 2 else 8
    pb = _round_up(b, m_align)
    ph = _round_up(h, 128)
    po = _round_up(out_dim, 128)
    if (pb, ph) != (b, h):
        x = jnp.pad(x, ((0, pb - b), (0, ph - h)))
    if (ph, po) != (h, out_dim):
        w_full = jnp.pad(w_full, ((0, ph - h), (0, po - out_dim)))

    # ---- tile selection
    tm = _pick_tile(pb, block_m, m_align)
    tk = _pick_tile(ph, block_k, 128, pref_align=256)
    tn = _pick_tile(po, block_n, 128, pref_align=256)

    # Guarantee >=2 output tiles across the parallel axes when possible so
    # v7x's two TensorCores both get work (single-TC chips pay ~one extra
    # grid step, which is noise).
    if (pb // tm) * (po // tn) < 2 and po >= 256:
        tn = _pick_tile(po, po // 2, 128)

    use_scratch = out_dtype != jnp.float32

    # ---- VMEM budgeting: 40 MiB keeps headroom even on v7x (64 MiB physical).
    vmem_budget = 40 * 1024 * 1024
    for _ in range(16):
        if _tile_vmem_bytes(tm, tn, tk, x_item, w_item, out_item, use_scratch) <= vmem_budget:
            break
        if tk > 128:
            tk = _pick_tile(ph, max(tk // 2, 128), 128)
        elif tn > 128:
            tn = _pick_tile(po, max(tn // 2, 128), 128)
        elif tm > m_align:
            tm = _pick_tile(pb, max(tm // 2, m_align), m_align)
        else:
            break

    grid = (pb // tm, po // tn, ph // tk)
    grid_m, grid_n, grid_k = grid

    est_bytes = _tile_vmem_bytes(tm, tn, tk, x_item, w_item, out_item, use_scratch)
    vmem_limit = min(56 * 1024 * 1024,
                     max(24 * 1024 * 1024, int(est_bytes * 1.25) + (4 << 20)))

    # Advisory cost: account for tiling re-reads (x re-read per N tile, w
    # re-read per M tile).
    cost = pl.CostEstimate(
        flops=2 * b * out_dim * h,
        transcendentals=0,
        bytes_accessed=(
            pb * ph * x_item * grid_n
            + ph * po * w_item * grid_m
            + pb * po * out_item
        ),
    )

    w_spec_kwargs = {}
    if weight_buffers and weight_buffers > 2:
        w_spec_kwargs["pipeline_mode"] = pl.Buffered(weight_buffers)

    in_specs = [
        # activations: K slice selected purely via index_map (no host transpose)
        pl.BlockSpec((tm, tk), lambda i, j, k: (i, k)),
        # weights: streamed lane-dense tiles
        pl.BlockSpec((tk, tn), lambda i, j, k: (k, j), **w_spec_kwargs),
    ]
    out_spec = pl.BlockSpec((tm, tn), lambda i, j, k: (i, j))

    compiler_params = pltpu.CompilerParams(
        # M, N parallel (megacore split on v7x); K is the all-reduce/reduction.
        dimension_semantics=("parallel", "parallel", "arbitrary"),
        vmem_limit_bytes=vmem_limit,
    )

    kernel = _make_kernel(compute_dtype, accumulate_into_out=not use_scratch)
    scratch_shapes = [pltpu.VMEM((tm, tn), jnp.float32)] if use_scratch else []

    grid_spec = pltpu.PrefetchScalarGridSpec(
        num_scalar_prefetch=0,
        grid=grid,
        in_specs=in_specs,
        out_specs=out_spec,
        scratch_shapes=scratch_shapes,
    )

    out = pl.pallas_call(
        kernel,
        out_shape=jax.ShapeDtypeStruct((pb, po), out_dtype),
        grid_spec=grid_spec,
        compiler_params=compiler_params,
        cost_estimate=cost,
    )(x, w_full)

    if (pb, po) != (b, out_dim):
        out = out[:b, :out_dim]
    return out


# ----------------------------------------------------------------------------
# Demo / self-test
# ----------------------------------------------------------------------------
if __name__ == "__main__":
    key = jax.random.PRNGKey(0)
    kx, kw, kx2, kw2 = jax.random.split(key, 4)

    TP = 4      # tp_degree = len(models)
    B = 16      # batch
    H = 512     # hidden, split 128 per shard
    O = 256     # output features

    x = jax.random.normal(kx, (B, H), dtype=jnp.float32)
    w_shards = jax.random.normal(kw, (TP, H // TP, O), dtype=jnp.float32) * 0.1
    w_full = w_shards.reshape(H, O)
    ref_f32 = x @ w_full

    # 1) Default path: compute dtype derived from inputs (f32), no casts anywhere.
    out = jax.block_until_ready(tensor_parallel_forward(x, w_shards))
    assert out.shape == (B, O) and out.dtype == jnp.float32
    assert jnp.allclose(out, ref_f32, atol=5e-2, rtol=2e-2), "mismatch (f32 path)"

    # 2) Explicit bf16 compute: f32 operands streamed and cast inside the
    #    kernel; small blocks force a multi-step (N, K) grid + K accumulation.
    out_bf_compute = jax.block_until_ready(
        tensor_parallel_forward(
            x, w_shards, block_n=128, block_k=128, compute_dtype=jnp.bfloat16
        )
    )
    ref_bf16 = jnp.dot(
        x.astype(jnp.bfloat16), w_full.astype(jnp.bfloat16),
        preferred_element_type=jnp.float32,
    )
    assert out_bf_compute.shape == (B, O)
    assert jnp.allclose(out_bf_compute, ref_bf16, atol=1e-2, rtol=1e-2), \
        "mismatch vs bf16 reference (in-kernel cast path)"
    assert jnp.allclose(out_bf_compute, ref_f32, atol=1e-1, rtol=2e-2), \
        "mismatch vs f32 reference (in-kernel cast path)"

    # 3) bf16 storage end-to-end (scratch-accumulator, bf16 output path).
    out_bf = jax.block_until_ready(
        tensor_parallel_forward(x.astype(jnp.bfloat16), w_shards.astype(jnp.bfloat16))
    )
    assert out_bf.shape == (B, O) and out_bf.dtype == jnp.bfloat16
    assert jnp.allclose(out_bf.astype(jnp.float32), ref_f32, atol=1e-1, rtol=5e-2), \
        "mismatch (bf16 output path)"

    # 4) Non-128-multiple shapes exercise the host pad/slice guard (no giant
    #    full-dim fallback tiles, lane-dense output).
    B2, H2, O2 = 10, 320, 200
    x2 = jax.random.normal(kx2, (B2, H2), dtype=jnp.float32)
    w2_shards = jax.random.normal(kw2, (TP, H2 // TP, O2), dtype=jnp.float32) * 0.1
    out2 = jax.block_until_ready(tensor_parallel_forward(x2, w2_shards))
    assert out2.shape == (B2, O2)
    assert jnp.allclose(out2, x2 @ w2_shards.reshape(H2, O2), atol=5e-2, rtol=2e-2), \
        "mismatch (padded-shape path)"

    print("KERNEL_OK")
</pallas_src>

<mosaic_0001>
module attributes {stable_mosaic.version = 11 : i64} {
  func.func @kernel(%arg0: i32, %arg1: i32, %arg2: i32, %arg3: memref<16x512xf32, #tpu.memory_space<vmem>>, %arg4: memref<512x128xf32, #tpu.memory_space<vmem>>, %arg5: memref<16x128xf32, #tpu.memory_space<vmem>>) attributes {dimension_semantics = [#tpu.dimension_semantics<parallel>, #tpu.dimension_semantics<parallel>, #tpu.dimension_semantics<arbitrary>], iteration_bounds = array<i64: 1, 2, 1>, scalar_prefetch = 0 : i64, scratch_operands = 0 : i64, tpu.core_type = #tpu.core_type<tc>, window_params = [{transform_indices = @transform_0, window_bounds = array<i64: 16, 512>}, {transform_indices = @transform_1, window_bounds = array<i64: 512, 128>}, {transform_indices = @transform_2, window_bounds = array<i64: 16, 128>}]} {
    %c0_i32 = arith.constant 0 : i32
    %0 = arith.cmpi eq, %arg2, %c0_i32 : i32
    %1 = arith.extui %0 : i1 to i32
    %c0_i32_0 = arith.constant 0 : i32
    %2 = arith.cmpi ne, %1, %c0_i32_0 : i32
    scf.if %2 {
      %cst_8 = arith.constant 0.000000e+00 : f32
      %9 = vector.broadcast %cst_8 : f32 to vector<16x128xf32>
      %c0_9 = arith.constant 0 : index
      %c0_10 = arith.constant 0 : index
      %10 = vector.load %arg5[%c0_9, %c0_10] : memref<16x128xf32, #tpu.memory_space<vmem>>, vector<16x128xf32>
      tpu.vector_store %arg5[%c0_9, %c0_10], %9 {strides = array<i32>} : memref<16x128xf32, #tpu.memory_space<vmem>>, vector<16x128xf32>,
    } else {
    }
    %c0 = arith.constant 0 : index
    %c0_1 = arith.constant 0 : index
    %3 = vector.load %arg3[%c0, %c0_1] : memref<16x512xf32, #tpu.memory_space<vmem>>, vector<16x512xf32>
    %c0_2 = arith.constant 0 : index
    %c0_3 = arith.constant 0 : index
    %4 = vector.load %arg4[%c0_2, %c0_3] : memref<512x128xf32, #tpu.memory_space<vmem>>, vector<512x128xf32>
    %c0_4 = arith.constant 0 : index
    %c0_5 = arith.constant 0 : index
    %5 = vector.load %arg5[%c0_4, %c0_5] : memref<16x128xf32, #tpu.memory_space<vmem>>, vector<16x128xf32>
    %cst = arith.constant dense<0.000000e+00> : vector<16x128xf32>
    %6 = tpu.matmul %3, %4, %cst {dimension_numbers = #tpu.dot_dimension_numbers<[1], [0], [0], [1], [0, 0, 1, 1], [], []>} : vector<16x512xf32>, vector<512x128xf32>, vector<16x128xf32> -> vector<16x128xf32>
    %7 = arith.addf %5, %6 : vector<16x128xf32>
    %c0_6 = arith.constant 0 : index
    %c0_7 = arith.constant 0 : index
    %8 = vector.load %arg5[%c0_6, %c0_7] : memref<16x128xf32, #tpu.memory_space<vmem>>, vector<16x128xf32>
    tpu.vector_store %arg5[%c0_6, %c0_7], %7 {strides = array<i32>} : memref<16x128xf32, #tpu.memory_space<vmem>>, vector<16x128xf32>,
    return
  }
  func.func @transform_0(%arg0: i32, %arg1: i32, %arg2: i32) -> (i32, i32) {
    %c0_i32 = arith.constant 0 : i32
    return %arg0, %arg2 : i32, i32
  }
  func.func @transform_1(%arg0: i32, %arg1: i32, %arg2: i32) -> (i32, i32) {
    %c0_i32 = arith.constant 0 : i32
    return %arg2, %arg1 : i32, i32
  }
  func.func @transform_2(%arg0: i32, %arg1: i32, %arg2: i32) -> (i32, i32) {
    %c0_i32 = arith.constant 0 : i32
    return %arg0, %arg1 : i32, i32
  }
}

</mosaic_0001>

<bundles_post_ra>
// kernel: tpu_custom_call.1
= control target key start
LH: loop header
LB: loop body
LE: loop exit
PB: predicated region body
PF: predicated region fallthrough
CT: control target
= control target key end

     0   :  { %7 = vsyncpa [#allocation3], 0  ;;  %s1007_s0 = inlined_call_operand.hbm [shape: f32[16,512], index: 0, kind: input, shape index: {}]   ;;  %s1008_s1 = inlined_call_operand.hbm [shape: f32[512,256], index: 1, kind: input, shape index: {}]   ;;  %s1009_s2 = inlined_call_operand.hbm [shape: f32[16,256], index: 2, kind: output, shape index: {}]  }
   0x1   :  { %8 = vsyncpa [#allocation6], 0 }
   0x2   :  { %10 = vsyncpa [#allocation6 + $0x1], 0 }
   0x3   :  { %11 = vsyncpa [#allocation4], 0 }
   0x4   :  { %13 = vsyncpa [#allocation4 + $0x1], 0  ;;  %s791_s9 = smov 0   ;;  %s793_s10 = smov 0  }
   0x5   :  { %s795_s11 = smov 0   ;;  %s797_s12 = smov 0  }
   0x6   :  { %s799_s13 = smov 0   ;;  %s801_s14 = smov 0  }
   0x7 LB: > { %s522_s15 = sadd.s32 4294967295, %s765_s14   ;;  %s523_s16 = sadd.s32 4294967294, %s765_s14   ;;  %s765_s14 = sphi %s801_s14, %s19_s14   ;;  %s761_s13 = sphi %s799_s13, %s1021_s13   ;;  %s757_s12 = sphi %s797_s12, %s1020_s12   ;;  %s753_s11 = sphi %s795_s11, %s1019_s11   ;;  %s749_s10 = sphi %s793_s10, %s1018_s10   ;;  %s745_s9 = sphi %s791_s9, %s1017_s9  }
   0x8   : > { %p88_p0 = scmp.ne.s32.totalorder %s749_s10, %s745_s9  ;;  %p825_p1 = scmp.eq.s32.totalorder %s522_s15, 0 }
   0x9   : > { %p829_p2 = scmp.eq.s32.totalorder %s522_s15, 1  ;;  %p120_p3 = scmp.eq.s32.totalorder %s523_s16, 1 }
   0xa   : > { %p835_p4 = por %p825_p1, %p88_p0  ;;  %p524_p5 = scmp.ge.s32.totalorder %s765_s14, 1 }
   0xb   : > { %p840_p6 = por %p120_p3, %p88_p0  ;;  %p127_p7 = scmp.lt.s32.totalorder %s765_s14, 3 }
   0xc   : > { %s144_s23 = sshll.u32 %s1007_s0, 4  ;;  %s767_s25 = smov [#allocation2]   ;;  %s145_s23 = int_to_ptr.hbm [resolvable:$true] %s144_s23 }
   0xd   : > { %p848_p8 = pnand %p524_p5, %p127_p7  ;;  %s146_s26 = sshll.u32 %s767_s25, 4  ;;  %s147_s26 = int_to_ptr.vmem [resolvable:$true] %s146_s26 }
   0xe   : > { %p526_p11 = scmp.ge.s32.totalorder %s765_s14, 2  ;;  %s768_s27 = smov 512  }
   0xf   : > { %p545_p9 = pneg %p848_p8  ;;  %s769_s28 = smov 32  }
  0x10   : > { %s34_s29 = sadd.s32 1, %s761_s13  ;;  %s75_s30 = sadd.s32 1, %s753_s11 }
  0x11   : > { %p546_p10 = pnand %p545_p9, %p825_p1  ;;  %p36_p12 = scmp.ge.s32.totalorder %s34_s29, 2 }
  0x12   : > { %p82_p13 = scmp.ne.s32.totalorder %s753_s11, %s749_s10  ;;  %p83_p0 = scmp.eq.s32.totalorder %s765_s14, 0 }
  0x13   : > { %548 = dma.hbm_to_vmem [thread:$0]  (!%p546_p10), %s145_s23, 1024, %s147_s26, [#allocation3], %s768_s27, %s768_s27, %s769_s28  }
  0x14   : > { %s1023_s29 = smov (%p36_p12, %s34_s29), 0  ;;  %p864_p3 = por %p83_p0, %p82_p13 }
  0x15   : > { %p870_p5 = por %p829_p2, %p82_p13  ;;  %s71_s5 = ssub.s32 %s761_s13, %s1023_s29 }
  0x16   : > { %p558_p7 = scmp.lt.s32.totalorder %s765_s14, 2  ;;  %p73_p9 = scmp.eq.s32.totalorder %s71_s5, 0 }
  0x17   : > { %s160_s6 = sand.u32 1, %s753_s11   ;;  %s528_s15 = sshll.u32 %s761_s13, 3 }
  0x18   : > { %s527_s7 = sshll.u32 %s160_s6, 9  ;;  %s171_s22 = scalar_lea.hbm %s1008_s1, %s528_s15 }
  0x19   : > { %s879_s8 = scalar_select %p73_p9, %s753_s11, %s75_s30  }
  0x1a   : > { %s164_s23 = scalar_lea.vmem [#allocation5], %s527_s7  ;;  %s172_s18 = sshll.u32 %s171_s22, 4  ;;  %s173_s18 = int_to_ptr.hbm [resolvable:$true] %s172_s18 }
  0x1b   : > { %s174_s25 = sshll.u32 %s164_s23, 4  ;;  %p550_p2 = pnand %p558_p7, %p864_p3  ;;  %s175_s25 = int_to_ptr.vmem [resolvable:$true] %s174_s25 }
  0x1c   : > { %s161_s26 = scalar_lea.sflag [#allocation6], %s160_s6  ;;  %s770_s27 = smov 256  }
  0x1d   : > { %s771_s28 = smov 128   ;;  %s772_s5 = smov 8  }
  0x1e   : > { %552 = dma.hbm_to_vmem [thread:$0]  (!%p550_p2), %s173_s18, 8192, %s175_s25, %s161_s26, %s770_s27, %s771_s28, %s772_s5  }
  0x1f   : > { %186 = sbr.rel (%p848_p8) target bundleno = 223 (0xdf), region = 28 }
  0x24   : > { %732 = dma.done.wait (%p825_p1), [#allocation3], 1024  }
  0x25   : > { %734 = vsyncadd (%p825_p1), [#allocation3], 4294966272  ;;  %s894_s30 = sand.u32 1, %s749_s10  }
  0x26   : > { %s531_s3 = sshll.u32 %s894_s30, 9  ;;  %s194_s6 = scalar_lea.sflag [#allocation6], %s894_s30 }
  0x27   : > { %s898_s7 = scalar_lea.vmem [#allocation5], %s531_s3 }
  0x28   : > { %736 = dma.done.wait (%p835_p4), %s194_s6, 8192  }
  0x29   : > { %738 = vsyncadd (%p835_p4), %s194_s6, 4294959104  ;;  %v284_v0 = vld [vmem:[%s898_s7 + $0x178] sm:$0xff]  ;;  %v283_v1 = vld [vmem:[%s898_s7 + $0x170] sm:$0xff]  ;;  %s532_s17 = sshll.u32 %s894_s30, 4  ;;  %s534_s19 = sshll.u32 %s757_s12, 3 }
  0x2a   : > { %v300_v2 = vld [vmem:[%s898_s7 + $0x1f8] sm:$0xff]  ;;  %349 = vmatpush.msra.mxu2 %v284_v0  ;;  %v282_v5 = vld [vmem:[%s898_s7 + $0x168] sm:$0xff]  ;;  %v299_v6 = vld [vmem:[%s898_s7 + $0x1f0] sm:$0xff]  ;;  %s413_s16 = scalar_lea.hbm %s1009_s2, %s534_s19  ;;  %s218_s21 = scalar_lea.vmem [#allocation7], %s532_s17 }
  0x2b   : > { %372 = vmatpush.msra.mxu3 %v300_v2  ;;  %v252_v3 = vld [vmem:[%s898_s7 + $0x78] sm:$0xff]  ;;  %v251_v7 = vld [vmem:[%s898_s7 + $0x70] sm:$0xff]  ;;  %v298_v9 = vld [vmem:[%s898_s7 + $0x1e8] sm:$0xff]  ;;  %s414_s22 = sshll.u32 %s218_s21, 4  ;;  %s416_s23 = sshll.u32 %s413_s16, 4  ;;  %s415_s22 = int_to_ptr.vmem [resolvable:$true] %s414_s22  ;;  %s417_s23 = int_to_ptr.hbm [resolvable:$true] %s416_s23 }
  0x2c   : > { %v268_v4 = vld [vmem:[%s898_s7 + $0xf8] sm:$0xff]  ;;  %303 = vmatpush.msra.mxu0 %v252_v3  ;;  %v267_v8 = vld [vmem:[%s898_s7 + $0xf0] sm:$0xff]  ;;  %350 = vmatpush.msra.mxu2 %v283_v1  ;;  %v250_v10 = vld [vmem:[%s898_s7 + $0x68] sm:$0xff]  ;;  %s400_s12 = scalar_lea.sflag [#allocation4], %s894_s30  ;;  %s693_s25 = sshra.s32 %s417_s23, 4  ;;  %s694_s25 = int_to_ptr.hbm [resolvable:$true] %s693_s25 }
  0x2d   : > { %326 = vmatpush.msra.mxu1 %v268_v4  ;;  %373 = vmatpush.msra.mxu3 %v299_v6  ;;  %v281_v11 = vld [vmem:[%s898_s7 + $0x160] sm:$0xff]  ;;  %v266_v12 = vld [vmem:[%s898_s7 + $0xe8] sm:$0xff]  ;;  %v280_v16 = vld [vmem:[%s898_s7 + $0x158] sm:$0xff]  ;;  %s695_s18 = scalar_lea.hbm %s694_s25, 16  ;;  %s699_s28 = scalar_lea.hbm %s1009_s2, 32 }
  0x2e   : > { %304 = vmatpush.msra.mxu0 %v251_v7  ;;  %v297_v13 = vld [vmem:[%s898_s7 + $0x1e0] sm:$0xff]  ;;  %351 = vmatpush.msra.mxu2 %v282_v5  ;;  %v296_v17 = vld [vmem:[%s898_s7 + $0x1d8] sm:$0xff]  ;;  %v279_v20 = vld [vmem:[%s898_s7 + $0x150] sm:$0xff]  ;;  %p696_p1 = scmp.ne.s32.totalorder %s694_s25, %s695_s18  ;;  %p700_p10 = scmp.lt.s32.totalorder %s694_s25, %s1009_s2 }
  0x2f   : > { %327 = vmatpush.msra.mxu1 %v267_v8  ;;  %374 = vmatpush.msra.mxu3 %v298_v9  ;;  %v249_v14 = vld [vmem:[%s898_s7 + $0x60] sm:$0xff]  ;;  %v248_v18 = vld [vmem:[%s898_s7 + $0x58] sm:$0xff]  ;;  %v295_v21 = vld [vmem:[%s898_s7 + $0x1d0] sm:$0xff]  ;;  %p701_p12 = scmp.lt.s32.totalorder %s699_s28, %s695_s18 }
  0x30   : > { %v265_v15 = vld [vmem:[%s898_s7 + $0xe0] sm:$0xff]  ;;  %305 = vmatpush.msra.mxu0 %v250_v10  ;;  %352 = vmatpush.msra.mxu2 %v281_v11  ;;  %v264_v19 = vld [vmem:[%s898_s7 + $0xd8] sm:$0xff]  ;;  %v247_v22 = vld [vmem:[%s898_s7 + $0x50] sm:$0xff]  ;;  %p697_p4 = pnand %p696_p1, %p870_p5 }
  0x31   : > { %328 = vmatpush.msra.mxu1 %v266_v12  ;;  %375 = vmatpush.msra.mxu3 %v297_v13  ;;  %v263_v23 = vld [vmem:[%s898_s7 + $0xd0] sm:$0xff]  ;;  %v278_v24 = vld [vmem:[%s898_s7 + $0x148] sm:$0xff]  ;;  %v277_v28 = vld [vmem:[%s898_s7 + $0x140] sm:$0xff]  ;;  %p702_p13 = por %p701_p12, %p700_p10 }
  0x32   : > { %306 = vmatpush.msra.mxu0 %v249_v14  ;;  %353 = vmatpush.msra.mxu2 %v280_v16  ;;  %v294_v25 = vld [vmem:[%s898_s7 + $0x1c8] sm:$0xff]  ;;  %v293_v29 = vld [vmem:[%s898_s7 + $0x1c0] sm:$0xff]  ;;  %v276_v32 = vld [vmem:[%s898_s7 + $0x138] sm:$0xff]  ;;  %p698_p8 = pneg %p697_p4 }
  0x33   : > { %329 = vmatpush.msra.mxu1 %v265_v15  ;;  %376 = vmatpush.msra.mxu3 %v296_v17  ;;  %v246_v26 = vld [vmem:[%s898_s7 + $0x48] sm:$0xff]  ;;  %v245_v30 = vld [vmem:[%s898_s7 + $0x40] sm:$0xff]  ;;  %v292_v33 = vld [vmem:[%s898_s7 + $0x1b8] sm:$0xff] }
  0x34   : > { %307 = vmatpush.msra.mxu0 %v248_v18  ;;  %354 = vmatpush.msra.mxu2 %v279_v20  ;;  %v262_v27 = vld [vmem:[%s898_s7 + $0xc8] sm:$0xff]  ;;  %v261_v31 = vld [vmem:[%s898_s7 + $0xc0] sm:$0xff]  ;;  %v244_v34 = vld [vmem:[%s898_s7 + $0x38] sm:$0xff]  ;;  %p703_p0 = pnand %p702_p13, %p698_p8 }
  0x35   : > { %330 = vmatpush.msra.mxu1 %v264_v19  ;;  %377 = vmatpush.msra.mxu3 %v295_v21  ;;  %v260_v35 = vld [vmem:[%s898_s7 + $0xb8] sm:$0xff]  ;;  %v275_v36 = vld [vmem:[%s898_s7 + $0x130] sm:$0xff]  ;;  %v274_v40 = vld [vmem:[%s898_s7 + $0x128] sm:$0xff] }
  0x36   : > { %308 = vmatpush.msra.mxu0 %v247_v22  ;;  %355 = vmatpush.msra.mxu2 %v278_v24  ;;  %v291_v37 = vld [vmem:[%s898_s7 + $0x1b0] sm:$0xff]  ;;  %v290_v41 = vld [vmem:[%s898_s7 + $0x1a8] sm:$0xff]  ;;  %v273_v44 = vld [vmem:[%s898_s7 + $0x120] sm:$0xff] }
  0x37   : > { %331 = vmatpush.msra.mxu1 %v263_v23  ;;  %378 = vmatpush.msra.mxu3 %v294_v25  ;;  %v243_v38 = vld [vmem:[%s898_s7 + $0x30] sm:$0xff]  ;;  %v242_v42 = vld [vmem:[%s898_s7 + $0x28] sm:$0xff]  ;;  %v289_v45 = vld [vmem:[%s898_s7 + $0x1a0] sm:$0xff] }
  0x38   : > { %309 = vmatpush.msra.mxu0 %v246_v26  ;;  %356 = vmatpush.msra.mxu2 %v277_v28  ;;  %v259_v39 = vld [vmem:[%s898_s7 + $0xb0] sm:$0xff]  ;;  %v258_v43 = vld [vmem:[%s898_s7 + $0xa8] sm:$0xff]  ;;  %v241_v46 = vld [vmem:[%s898_s7 + $0x20] sm:$0xff] }
  0x39   : > { %332 = vmatpush.msra.mxu1 %v262_v27  ;;  %379 = vmatpush.msra.mxu3 %v293_v29  ;;  %v257_v47 = vld [vmem:[%s898_s7 + $0xa0] sm:$0xff]  ;;  %v272_v48 = vld [vmem:[%s898_s7 + $0x118] sm:$0xff]  ;;  %v271_v52 = vld [vmem:[%s898_s7 + $0x110] sm:$0xff] }
  0x3a   : > { %310 = vmatpush.msra.mxu0 %v245_v30  ;;  %357 = vmatpush.msra.mxu2 %v276_v32  ;;  %v288_v49 = vld [vmem:[%s898_s7 + $0x198] sm:$0xff]  ;;  %v287_v53 = vld [vmem:[%s898_s7 + $0x190] sm:$0xff]  ;;  %v270_v56 = vld [vmem:[%s898_s7 + $0x108] sm:$0xff] }
  0x3b   : > { %333 = vmatpush.msra.mxu1 %v261_v31  ;;  %380 = vmatpush.msra.mxu3 %v292_v33  ;;  %v240_v50 = vld [vmem:[%s898_s7 + $0x18] sm:$0xff]  ;;  %v239_v54 = vld [vmem:[%s898_s7 + $0x10] sm:$0xff]  ;;  %v286_v57 = vld [vmem:[%s898_s7 + $0x188] sm:$0xff] }
  0x3c   : > { %311 = vmatpush.msra.mxu0 %v244_v34  ;;  %358 = vmatpush.msra.mxu2 %v275_v36  ;;  %v256_v51 = vld [vmem:[%s898_s7 + $0x98] sm:$0xff]  ;;  %v255_v55 = vld [vmem:[%s898_s7 + $0x90] sm:$0xff]  ;;  %v238_v58 = vld [vmem:[%s898_s7 + $0x8] sm:$0xff] }
  0x3d   : > { %334 = vmatpush.msra.mxu1 %v260_v35  ;;  %381 = vmatpush.msra.mxu3 %v291_v37  ;;  %v254_v59 = vld [vmem:[%s898_s7 + $0x88] sm:$0xff]  ;;  %v269_v60 = vld [vmem:[%s898_s7 + $0x100] sm:$0xff]  ;;  %v231_v62 = vld [vmem:[#allocation2 + $0x10] sm:$0xff] }
  0x3e   : > { %312 = vmatpush.msra.mxu0 %v243_v38  ;;  %359 = vmatpush.msra.mxu2 %v274_v40  ;;  %v285_v61 = vld [vmem:[%s898_s7 + $0x180] sm:$0xff]  ;;  %v232_v63 = vld [vmem:[#allocation2 + $0x18] sm:$0xff]  ;;  %v230_v3 = vld [vmem:[#allocation2 + $0x8] sm:$0xff] }
  0x3f   : > { %335 = vmatpush.msra.mxu1 %v259_v39  ;;  %382 = vmatpush.msra.mxu3 %v290_v41  ;;  %v237_v0 = vld [vmem:[%s898_s7] sm:$0xff]  ;;  %v235_v4 = vld [vmem:[#allocation2 + $0x30] sm:$0xff]  ;;  %v236_v5 = vld [vmem:[#allocation2 + $0x38] sm:$0xff] }
  0x40   : > { %313 = vmatpush.msra.mxu0 %v242_v42  ;;  %360 = vmatpush.msra.mxu2 %v273_v44  ;;  %v253_v1 = vld [vmem:[%s898_s7 + $0x80] sm:$0xff]  ;;  %v234_v7 = vld [vmem:[#allocation2 + $0x28] sm:$0xff] }
  0x41   : > { %336 = vmatpush.msra.mxu1 %v258_v43  ;;  %383 = vmatpush.msra.mxu3 %v289_v45  ;;  %v229_v2 = vld [vmem:[#allocation2] sm:$0xff] }
  0x42   : > { %314 = vmatpush.msra.mxu0 %v241_v46  ;;  %361 = vmatpush.msra.mxu2 %v272_v48  ;;  %v233_v6 = vld [vmem:[#allocation2 + $0x20] sm:$0xff] }
  0x43   : > { %337 = vmatpush.msra.mxu1 %v257_v47  ;;  %384 = vmatpush.msra.mxu3 %v288_v49 }
  0x44   : > { %315 = vmatpush.msra.mxu0 %v240_v50  ;;  %362 = vmatpush.msra.mxu2 %v271_v52 }
  0x45   : > { %338 = vmatpush.msra.mxu1 %v256_v51  ;;  %385 = vmatpush.msra.mxu3 %v287_v53 }
  0x46   : > { %316 = vmatpush.msra.mxu0 %v239_v54  ;;  %363 = vmatpush.msra.mxu2 %v270_v56 }
  0x47   : > { %339 = vmatpush.msra.mxu1 %v255_v55  ;;  %386 = vmatpush.msra.mxu3 %v286_v57 }
  0x48   : > { %317 = vmatpush.msra.mxu0 %v238_v58  ;;  %364 = vmatpush.msra.mxu2 %v269_v60 }
  0x49   : > { %340 = vmatpush.msra.mxu1 %v254_v59  ;;  %387 = vmatpush.msra.mxu3 %v285_v61 }
  0x4a   : > { %365 = vmatmul.f32.vlgmr.msra.gmra.mxu2 %v231_v62  ;;  %388 = vmatmul.f32.vlgmr.msra.gmra.mxu3 %v232_v63 }
  0x4b   : > { %318 = vmatpush.msra.mxu0 %v237_v0  ;;  %341 = vmatpush.msra.mxu1 %v253_v1 }
  0x4c   : > { %319 = vmatmul.f32.vlgmr.msra.gmra.mxu0 %v229_v2  ;;  %342 = vmatmul.f32.vlgmr.msra.gmra.mxu1 %v230_v3 }
  0x52   : > { %368 = vmatmul.f32.gmra.mxu2 %v235_v4  ;;  %391 = vmatmul.f32.gmra.mxu3 %v236_v5 }
  0x54   : > { %322 = vmatmul.f32.gmra.mxu0 %v233_v6  ;;  %345 = vmatmul.f32.gmra.mxu1 %v234_v7 }
  0xc9   : > { %v320_v8 = vpop.f32.mrf.mxu0  ;;  %v343_v9 = vpop.f32.mrf.mxu1 }
  0xca   : > { %v344_v10 = vadd.f32 %v343_v9, %v320_v8 }
  0xcd   : > { %v366_v11 = vpop.f32.mrf.mxu2  ;;  %v389_v12 = vpop.f32.mrf.mxu3 }
  0xce   : > { %v367_v13 = vadd.f32 %v366_v11, %v344_v10 }
  0xd0   : > { %v390_v14 = vadd.f32 %v389_v12, %v367_v13 }
  0xd1   : > { %v323_v15 = vpop.f32.mrf.mxu0  ;;  %v346_v16 = vpop.f32.mrf.mxu1 }
  0xd2   : > { %v347_v17 = vadd.f32 %v346_v16, %v323_v15  ;;  %397 = vst [vmem:[%s218_s21] sm:$0xff] %v390_v14 }
  0xd5   : > { %v369_v18 = vpop.f32.mrf.mxu2  ;;  %v392_v19 = vpop.f32.mrf.mxu3 }
  0xd6   : > { %v370_v20 = vadd.f32 %v369_v18, %v347_v17 }
  0xd8   : > { %v393_v21 = vadd.f32 %v392_v19, %v370_v20 }
  0xda   : > { %398 = vst [vmem:[%s218_s21 + $0x8] sm:$0xff] %v393_v21 }
  0xdb   : > { %706 = shalt.err (!%p703_p0)
}
  0xdc   : > { %s773_s30 = smov 128   ;;  %s774_s6 = smov 256  }
  0xdd   : > { %s775_s7 = smov 8  }
  0xde   : > { %543 = dma.vmem_to_hbm [thread:$0]  (%p870_p5), %s415_s22, 256, %s417_s23, %s400_s12, %s773_s30, %s774_s6, %s775_s7  }
  0xdf PF: > { %s431_s17 = sand.u32 1, %s745_s9   ;;  %p554_p3 = pnand %p526_p11, %p840_p6 }
  0xe0   : > { %s432_s19 = scalar_lea.sflag [#allocation4], %s431_s17 }
  0xe1   : > { %p555_p7 = pneg %p554_p3 }
  0xe3   : > { %740 = dma.done.wait (%p555_p7), %s432_s19, 256  }
  0xe4   : > { %742 = vsyncadd (%p555_p7), %s432_s19, 4294967040  ;;  %s19_s14 = sadd.s32 1, %s765_s14   ;;  %s1017_s9 = smov %s749_s10 }
  0xe5   : > { %p16_p9 = scmp.ge.s32.totalorder %s19_s14, 4   ;;  %s1018_s10 = smov %s753_s11 }
  0xe6   : > { %s1019_s11 = smov %s879_s8  ;;  %s1020_s12 = smov %s761_s13 }
  0xe7   : > { %s1021_s13 = smov %s1023_s29  ;;  %18 = sbr.rel (!%p16_p9) target bundleno = 7 (0x7), region = 83 }
  0xec   :  { %438 = vsyncpa [#allocation3], 1 }
  0xed   :  { %440 = vsyncpa [#allocation3 + $0x1], 1 }
  0xee   :  { %441 = vsyncpa [#allocation6], 1 }
  0xef   :  { %443 = vsyncpa [#allocation6 + $0x1], 1 }
  0xf0   :  { %444 = vsyncpa [#allocation4], 1 }
  0xf1   :  { %446 = vsyncpa [#allocation4 + $0x1], 1 }

</bundles_post_ra>
